<compile_context>
chip_gen: v7x
topology: tpu7x:2x2x1
jax: 0.10.0
libtpu: 0.0.40
codegen_flags: <defaults>
</compile_context>

<pallas_src>
import math
from functools import partial

import jax
import jax.numpy as jnp
import numpy as np
from jax.experimental import pallas as pl
from jax.experimental.pallas import tpu as pltpu

LANE = 128
SUBLANE = 8


def _round_up(x, m):
    return (x + m - 1) // m * m


def _cdiv(a, b):
    return -(-a // b)


# ----------------------------------------------------------------------------
# Parameter / filter construction (plain-JAX glue; tiny, once per forward).
# ----------------------------------------------------------------------------
def sinc_init_params(kernel_size, out_channels, sample_rate=60.0,
                     min_low_hz=0.0, min_band_hz=1.0):
    """Deterministic init, matching SincConv.__init__."""
    if kernel_size % 2 == 0:
        kernel_size = kernel_size + 1
    hz = np.linspace(min_low_hz,
                     sample_rate / 2 - (min_low_hz + min_band_hz),
                     out_channels + 1)
    low_hz_ = jnp.asarray(hz[:-1], dtype=jnp.float32).reshape(-1, 1)
    band_hz_ = jnp.asarray(np.diff(hz), dtype=jnp.float32).reshape(-1, 1)
    return kernel_size, low_hz_, band_hz_


def sinc_build_filters(low_hz_, band_hz_, kernel_size, sample_rate=60.0,
                       min_low_hz=0.0, min_band_hz=1.0):
    """Reproduces the band-pass filter construction in SincConv.forward."""
    half = int(kernel_size / 2)
    n_lin = jnp.linspace(0.0, kernel_size / 2 - 1, half, dtype=jnp.float32)
    window_ = 0.54 - 0.46 * jnp.cos(2.0 * math.pi * n_lin / kernel_size)
    n = (kernel_size - 1) / 2.0
    n_ = (2 * math.pi * jnp.arange(-n, 0, dtype=jnp.float32).reshape(1, -1)
          / sample_rate)

    low = min_low_hz + jnp.abs(low_hz_)                                  # (C, 1)
    high = jnp.clip(low + min_band_hz + jnp.abs(band_hz_),
                    min_low_hz, sample_rate / 2)                         # (C, 1)
    band = (high - low)[:, 0]                                            # (C,)

    f_times_t_low = jnp.matmul(low, n_)
    f_times_t_high = jnp.matmul(high, n_)

    band_pass_left = ((jnp.sin(f_times_t_high) - jnp.sin(f_times_t_low))
                      / (n_ / 2)) * window_                              # (C, half)
    band_pass_center = 2 * band.reshape(-1, 1)
    band_pass_right = jnp.flip(band_pass_left, axis=1)

    band_pass = jnp.concatenate(
        [band_pass_left, band_pass_center, band_pass_right], axis=1)     # (C, K)
    # NOTE: mirrors PyTorch exactly; band == 0 (fully clipped) gives inf/nan.
    band_pass = band_pass / (2 * band[:, None])
    return band_pass.astype(jnp.float32)                                 # (C, K)


# ----------------------------------------------------------------------------
# Banded-Toeplitz weight construction (wrapper side, once per forward).
# ----------------------------------------------------------------------------
def _toeplitz_weights(filters, Kb):
    """WA[c,j,r] = f[c, j-r] (banded), WB[c,j',r] = f[c, 128+j'-r] (wrap)."""
    _, K = filters.shape
    r = jnp.arange(LANE)[None, :]
    d_lo = jnp.arange(LANE)[:, None] - r                                 # (128,128)
    wa = jnp.where((d_lo >= 0) & (d_lo < K),
                   filters[:, jnp.clip(d_lo, 0, K - 1)], 0.0)            # (C,128,128)
    d_hi = LANE + jnp.arange(Kb)[:, None] - r                            # (Kb,128)
    wb = jnp.where((d_hi >= 0) & (d_hi < K),
                   filters[:, jnp.clip(d_hi, 0, K - 1)], 0.0)            # (C,Kb,128)
    return wa, wb


def _pair_channels(w):
    """(C, D, 128) -> (ceil(C/2), D, 256): two output channels per MXU weight."""
    C = w.shape[0]
    if C % 2:
        w = jnp.concatenate([w, jnp.zeros_like(w[:1])], axis=0)
    return jnp.concatenate([w[0::2], w[1::2]], axis=-1)


def _pick_tile(T128, max_tile_t, min_tiles):
    """Time tile: multiple of 128; multiple of 1024 (8 blocks) when tiling."""
    if T128 <= max_tile_t and min_tiles <= 1:
        return T128
    if T128 < 2 * SUBLANE * LANE:            # too short to split into 8-block tiles
        return T128
    S = max(min_tiles, _cdiv(T128, max_tile_t))
    return max(_round_up(_cdiv(T128, S), SUBLANE * LANE), SUBLANE * LANE)


# ----------------------------------------------------------------------------
# Pallas kernel: depth-1 conv1d as banded-Toeplitz MXU matmuls per time tile.
# ----------------------------------------------------------------------------
def _sinc_toeplitz_kernel(x_ref, wa_ref, wb_ref, o_ref, *, nQ, Kb, C, G):
    # x_ref : (1, nBlk, 128) f32  padded waveform row for this batch element
    #                             (VMEM-resident across its time tiles)
    # wa_ref: (G, 128, 256)  bf16 banded Toeplitz weights, channel pair g
    # wb_ref: (G, Kb,  256)  bf16 wrap-block weights (next 128-sample block)
    # o_ref : (1, C, nQ, 128) f32 blocked output tile (time = nQ * 128)
    j = pl.program_id(1)
    q0 = j * nQ
    if nQ % SUBLANE == 0:
        q0 = pl.multiple_of(q0, SUBLANE)

    x_win = x_ref[0, pl.ds(q0, nQ + 1), :]              # (nQ+1, 128) f32
    x_lo = x_win[:nQ, :].astype(jnp.bfloat16)           # (nQ, 128)
    x_hi = x_win[1:, :Kb].astype(jnp.bfloat16)          # (nQ, Kb)

    for g in range(G):
        res = jnp.dot(x_lo, wa_ref[g], preferred_element_type=jnp.float32)
        res = res + jnp.dot(x_hi, wb_ref[g], preferred_element_type=jnp.float32)
        c0 = 2 * g
        o_ref[0, c0] = res[:, :LANE].astype(o_ref.dtype)
        if c0 + 1 < C:
            o_ref[0, c0 + 1] = res[:, LANE:].astype(o_ref.dtype)


def sinc_conv1d_pallas(x_pad, filters, T, *, max_tile_t=8192):
    """x_pad: (B, 1, T + K - 1) reflect-padded waveform; filters: (C, K).

    Returns (B, C, T).
    """
    B, _, Tp = x_pad.shape
    C, K = filters.shape
    assert K <= LANE + 1, "Toeplitz decomposition assumes kernel_size <= 129"

    Kb = max(SUBLANE, _round_up(max(K - 1, 1), SUBLANE))     # wrap-block depth
    T128 = _round_up(T, LANE)
    min_tiles = 2 if B == 1 else 1           # keep both v7x TensorCores busy
    tT = _pick_tile(T128, _round_up(max_tile_t, LANE), min_tiles)
    S = _cdiv(T128, tT)                      # time tiles
    nQ = tT // LANE                          # 128-sample blocks per tile
    T_pad = S * tT
    Lp = T_pad + LANE                        # +1 block: every window in-bounds
    nBlk = Lp // LANE

    # Zero-extend the reflect-padded row and view it as 128-wide blocks (the
    # reshape is free).  Outputs in [T, T_pad) read zero padding and are
    # trimmed below (only when T is not a multiple of 128 / tiles don't fit).
    # TODO(synk): for very long sequences, do the reflect padding in-kernel on
    # a raw (memory_space=pl.ANY) waveform and window x with manual DMA so the
    # resident-row VMEM does not grow with T (v7x 64 MiB).
    x_al = jnp.pad(x_pad, ((0, 0), (0, 0), (0, Lp - Tp)))
    x_blk = x_al.reshape(B, nBlk, LANE)

    wa, wb = _toeplitz_weights(filters, Kb)
    wa2 = _pair_channels(wa).astype(jnp.bfloat16)            # (G, 128, 256)
    wb2 = _pair_channels(wb).astype(jnp.bfloat16)            # (G, Kb, 256)
    G = wa2.shape[0]

    kernel = partial(_sinc_toeplitz_kernel, nQ=nQ, Kb=Kb, C=C, G=G)

    # VMEM budget tracks the actual resident sizes (double-buffered blocks),
    # capped by the physical VMEM of this chip (64 MiB on v7x, 128 otherwise).
    x_bytes = nBlk * LANE * 4
    w_bytes = (G * LANE * 2 * LANE + G * Kb * 2 * LANE) * 2          # bf16
    o_bytes = C * nQ * LANE * 4
    vmem_need = 2 * (x_bytes + w_bytes + o_bytes) + (2 << 20)
    try:
        phys_vmem = pltpu.get_tpu_info().vmem_capacity_bytes
    except Exception:
        phys_vmem = 128 * 1024 * 1024
    cap = min(int(0.75 * phys_vmem), 100 * 1024 * 1024)
    vmem_limit = int(min(max(vmem_need + (8 << 20), 32 * 1024 * 1024), cap))

    cost = pl.CostEstimate(
        flops=2 * B * C * K * T,
        transcendentals=0,
        bytes_accessed=int(4 * B * Lp + 2 * (wa2.size + wb2.size)
                           + 4 * B * C * T_pad))

    out = pl.pallas_call(
        kernel,
        out_shape=jax.ShapeDtypeStruct((B, C, S * nQ, LANE), x_pad.dtype),
        grid_spec=pltpu.PrefetchScalarGridSpec(
            num_scalar_prefetch=0,
            grid=(B, S),
            in_specs=[
                pl.BlockSpec((1, nBlk, LANE), lambda b, j: (b, 0, 0)),
                pl.BlockSpec((G, LANE, 2 * LANE), lambda b, j: (0, 0, 0)),
                pl.BlockSpec((G, Kb, 2 * LANE), lambda b, j: (0, 0, 0)),
            ],
            out_specs=pl.BlockSpec((1, C, nQ, LANE),
                                   lambda b, j: (b, 0, j, 0)),
        ),
        compiler_params=pltpu.CompilerParams(
            dimension_semantics=("parallel", "parallel"),
            vmem_limit_bytes=vmem_limit),
        cost_estimate=cost,
    )(x_blk, wa2, wb2)

    out = out.reshape(B, C, T_pad)            # free: contiguous blocked layout
    if T_pad != T:
        out = out[:, :, :T]
    return out


# ----------------------------------------------------------------------------
# Full forward (matches SincConv.forward).
# ----------------------------------------------------------------------------
def sinc_conv_forward(waveforms, low_hz_, band_hz_, kernel_size,
                      sample_rate=60.0, min_low_hz=0.0, min_band_hz=1.0):
    # waveforms: (B, 1, T)
    B, _, T = waveforms.shape
    filters = sinc_build_filters(low_hz_, band_hz_, kernel_size,
                                 sample_rate, min_low_hz, min_band_hz)   # (C, K)
    pad = kernel_size // 2                    # reflect pad requires pad < T
    x_p = jnp.pad(waveforms, ((0, 0), (0, 0), (pad, pad)), mode="reflect")
    return sinc_conv1d_pallas(x_p, filters, T)                           # (B, C, T)


if __name__ == "__main__":
    # Module config (kernel_size even -> bumped to odd, as in __init__)
    OUT_CHANNELS = 8
    KERNEL_SIZE_IN = 32
    SAMPLE_RATE = 60.0

    kernel_size, low_hz_, band_hz_ = sinc_init_params(
        KERNEL_SIZE_IN, OUT_CHANNELS, sample_rate=SAMPLE_RATE)

    # Deterministic small input: batch=2, 1 input channel, seq=128
    key = jax.random.PRNGKey(0)
    waveforms = jax.random.normal(key, (2, 1, 128), dtype=jnp.float32)

    out = sinc_conv_forward(waveforms, low_hz_, band_hz_, kernel_size,
                            sample_rate=SAMPLE_RATE)
    out = jax.block_until_ready(out)

    assert out.shape == (2, OUT_CHANNELS, 128), out.shape
    assert out.dtype == jnp.float32

    # Reference: same conv at HIGHEST precision on operands rounded to bf16
    # (the kernel feeds the MXU bf16 operands with exact f32 accumulation, a
    # documented deviation from bit-exact f32 conv), so the tolerance below
    # only has to absorb accumulation order, not operand rounding.
    filters = sinc_build_filters(low_hz_, band_hz_, kernel_size,
                                 sample_rate=SAMPLE_RATE)
    pad = kernel_size // 2
    x_p = jnp.pad(waveforms, ((0, 0), (0, 0), (pad, pad)), mode="reflect")
    f_bf = filters.astype(jnp.bfloat16).astype(jnp.float32)
    x_bf = x_p.astype(jnp.bfloat16).astype(jnp.float32)
    ref = jax.lax.conv_general_dilated(
        x_bf, f_bf[:, None, :], window_strides=(1,), padding="VALID",
        dimension_numbers=("NCH", "OIH", "NCH"),
        precision=jax.lax.Precision.HIGHEST)
    np.testing.assert_allclose(np.asarray(out), np.asarray(ref),
                               rtol=2e-3, atol=2e-3)

    print("KERNEL_OK")
</pallas_src>

<mosaic_0001>
module attributes {stable_mosaic.version = 11 : i64} {
  func.func @_sinc_toeplitz_kernel(%arg0: i32, %arg1: i32, %arg2: memref<1x2x128xf32, #tpu.memory_space<vmem>>, %arg3: memref<4x128x256xbf16, #tpu.memory_space<vmem>>, %arg4: memref<4x32x256xbf16, #tpu.memory_space<vmem>>, %arg5: memref<1x8x1x128xf32, #tpu.memory_space<vmem>>) attributes {dimension_semantics = [#tpu.dimension_semantics<parallel>, #tpu.dimension_semantics<parallel>], iteration_bounds = array<i64: 2, 1>, scalar_prefetch = 0 : i64, scratch_operands = 0 : i64, tpu.core_type = #tpu.core_type<tc>, window_params = [{transform_indices = @transform_0, window_bounds = array<i64: 1, 2, 128>}, {pipeline_mode = #tpu.pipeline_mode<synchronous>, transform_indices = @transform_1, window_bounds = array<i64: 4, 128, 256>}, {pipeline_mode = #tpu.pipeline_mode<synchronous>, transform_indices = @transform_2, window_bounds = array<i64: 4, 32, 256>}, {transform_indices = @transform_3, window_bounds = array<i64: 1, 8, 1, 128>}]} {
    %c1_i32 = arith.constant 1 : i32
    %0 = arith.muli %arg1, %c1_i32 : i32
    %c0 = arith.constant 0 : index
    %1 = arith.index_cast %0 : i32 to index
    %c0_0 = arith.constant 0 : index
    %2 = vector.load %arg2[%c0, %1, %c0_0] : memref<1x2x128xf32, #tpu.memory_space<vmem>>, vector<1x2x128xf32>
    %3 = vector.shape_cast %2 : vector<1x2x128xf32> to vector<2x128xf32>
    %4 = vector.extract_strided_slice %3 {offsets = [0, 0], sizes = [1, 128], strides = [1, 1]} : vector<2x128xf32> to vector<1x128xf32>
    %5 = arith.truncf %4 : vector<1x128xf32> to vector<1x128xbf16>
    %6 = vector.extract_strided_slice %3 {offsets = [1, 0], sizes = [1, 32], strides = [1, 1]} : vector<2x128xf32> to vector<1x32xf32>
    %7 = arith.truncf %6 : vector<1x32xf32> to vector<1x32xbf16>
    %c0_1 = arith.constant 0 : index
    %c0_2 = arith.constant 0 : index
    %c0_3 = arith.constant 0 : index
    %8 = vector.load %arg3[%c0_1, %c0_2, %c0_3] : memref<4x128x256xbf16, #tpu.memory_space<vmem>>, vector<1x128x256xbf16>
    %9 = vector.shape_cast %8 : vector<1x128x256xbf16> to vector<128x256xbf16>
    %cst = arith.constant dense<0.000000e+00> : vector<1x256xf32>
    %10 = tpu.matmul %5, %9, %cst {dimension_numbers = #tpu.dot_dimension_numbers<[1], [0], [0], [1], [0, 0, 1, 1], [], []>} : vector<1x128xbf16>, vector<128x256xbf16>, vector<1x256xf32> -> vector<1x256xf32>
    %c0_4 = arith.constant 0 : index
    %c0_5 = arith.constant 0 : index
    %c0_6 = arith.constant 0 : index
    %11 = vector.load %arg4[%c0_4, %c0_5, %c0_6] : memref<4x32x256xbf16, #tpu.memory_space<vmem>>, vector<1x32x256xbf16>
    %12 = vector.shape_cast %11 : vector<1x32x256xbf16> to vector<32x256xbf16>
    %cst_7 = arith.constant dense<0.000000e+00> : vector<1x256xf32>
    %13 = tpu.matmul %7, %12, %cst_7 {dimension_numbers = #tpu.dot_dimension_numbers<[1], [0], [0], [1], [0, 0, 1, 1], [], []>} : vector<1x32xbf16>, vector<32x256xbf16>, vector<1x256xf32> -> vector<1x256xf32>
    %14 = arith.addf %10, %13 : vector<1x256xf32>
    %15 = vector.extract_strided_slice %14 {offsets = [0, 0], sizes = [1, 128], strides = [1, 1]} : vector<1x256xf32> to vector<1x128xf32>
    %c0_8 = arith.constant 0 : index
    %c0_9 = arith.constant 0 : index
    %c0_10 = arith.constant 0 : index
    %c0_11 = arith.constant 0 : index
    %16 = vector.load %arg5[%c0_8, %c0_9, %c0_10, %c0_11] : memref<1x8x1x128xf32, #tpu.memory_space<vmem>>, vector<1x1x1x128xf32>
    %17 = vector.shape_cast %16 : vector<1x1x1x128xf32> to vector<1x128xf32>
    %18 = vector.shape_cast %15 : vector<1x128xf32> to vector<1x1x1x128xf32>
    tpu.vector_store %arg5[%c0_8, %c0_9, %c0_10, %c0_11], %18 {strides = array<i32>} : memref<1x8x1x128xf32, #tpu.memory_space<vmem>>, vector<1x1x1x128xf32>,
    %19 = vector.extract_strided_slice %14 {offsets = [0, 128], sizes = [1, 128], strides = [1, 1]} : vector<1x256xf32> to vector<1x128xf32>
    %c0_12 = arith.constant 0 : index
    %c1 = arith.constant 1 : index
    %c0_13 = arith.constant 0 : index
    %c0_14 = arith.constant 0 : index
    %20 = vector.load %arg5[%c0_12, %c1, %c0_13, %c0_14] : memref<1x8x1x128xf32, #tpu.memory_space<vmem>>, vector<1x1x1x128xf32>
    %21 = vector.shape_cast %20 : vector<1x1x1x128xf32> to vector<1x128xf32>
    %22 = vector.shape_cast %19 : vector<1x128xf32> to vector<1x1x1x128xf32>
    tpu.vector_store %arg5[%c0_12, %c1, %c0_13, %c0_14], %22 {strides = array<i32>} : memref<1x8x1x128xf32, #tpu.memory_space<vmem>>, vector<1x1x1x128xf32>,
    %c1_15 = arith.constant 1 : index
    %c0_16 = arith.constant 0 : index
    %c0_17 = arith.constant 0 : index
    %23 = vector.load %arg3[%c1_15, %c0_16, %c0_17] : memref<4x128x256xbf16, #tpu.memory_space<vmem>>, vector<1x128x256xbf16>
    %24 = vector.shape_cast %23 : vector<1x128x256xbf16> to vector<128x256xbf16>
    %cst_18 = arith.constant dense<0.000000e+00> : vector<1x256xf32>
    %25 = tpu.matmul %5, %24, %cst_18 {dimension_numbers = #tpu.dot_dimension_numbers<[1], [0], [0], [1], [0, 0, 1, 1], [], []>} : vector<1x128xbf16>, vector<128x256xbf16>, vector<1x256xf32> -> vector<1x256xf32>
    %c1_19 = arith.constant 1 : index
    %c0_20 = arith.constant 0 : index
    %c0_21 = arith.constant 0 : index
    %26 = vector.load %arg4[%c1_19, %c0_20, %c0_21] : memref<4x32x256xbf16, #tpu.memory_space<vmem>>, vector<1x32x256xbf16>
    %27 = vector.shape_cast %26 : vector<1x32x256xbf16> to vector<32x256xbf16>
    %cst_22 = arith.constant dense<0.000000e+00> : vector<1x256xf32>
    %28 = tpu.matmul %7, %27, %cst_22 {dimension_numbers = #tpu.dot_dimension_numbers<[1], [0], [0], [1], [0, 0, 1, 1], [], []>} : vector<1x32xbf16>, vector<32x256xbf16>, vector<1x256xf32> -> vector<1x256xf32>
    %29 = arith.addf %25, %28 : vector<1x256xf32>
    %30 = vector.extract_strided_slice %29 {offsets = [0, 0], sizes = [1, 128], strides = [1, 1]} : vector<1x256xf32> to vector<1x128xf32>
    %c0_23 = arith.constant 0 : index
    %c2 = arith.constant 2 : index
    %c0_24 = arith.constant 0 : index
    %c0_25 = arith.constant 0 : index
    %31 = vector.load %arg5[%c0_23, %c2, %c0_24, %c0_25] : memref<1x8x1x128xf32, #tpu.memory_space<vmem>>, vector<1x1x1x128xf32>
    %32 = vector.shape_cast %31 : vector<1x1x1x128xf32> to vector<1x128xf32>
    %33 = vector.shape_cast %30 : vector<1x128xf32> to vector<1x1x1x128xf32>
    tpu.vector_store %arg5[%c0_23, %c2, %c0_24, %c0_25], %33 {strides = array<i32>} : memref<1x8x1x128xf32, #tpu.memory_space<vmem>>, vector<1x1x1x128xf32>,
    %34 = vector.extract_strided_slice %29 {offsets = [0, 128], sizes = [1, 128], strides = [1, 1]} : vector<1x256xf32> to vector<1x128xf32>
    %c0_26 = arith.constant 0 : index
    %c3 = arith.constant 3 : index
    %c0_27 = arith.constant 0 : index
    %c0_28 = arith.constant 0 : index
    %35 = vector.load %arg5[%c0_26, %c3, %c0_27, %c0_28] : memref<1x8x1x128xf32, #tpu.memory_space<vmem>>, vector<1x1x1x128xf32>
    %36 = vector.shape_cast %35 : vector<1x1x1x128xf32> to vector<1x128xf32>
    %37 = vector.shape_cast %34 : vector<1x128xf32> to vector<1x1x1x128xf32>
    tpu.vector_store %arg5[%c0_26, %c3, %c0_27, %c0_28], %37 {strides = array<i32>} : memref<1x8x1x128xf32, #tpu.memory_space<vmem>>, vector<1x1x1x128xf32>,
    %c2_29 = arith.constant 2 : index
    %c0_30 = arith.constant 0 : index
    %c0_31 = arith.constant 0 : index
    %38 = vector.load %arg3[%c2_29, %c0_30, %c0_31] : memref<4x128x256xbf16, #tpu.memory_space<vmem>>, vector<1x128x256xbf16>
    %39 = vector.shape_cast %38 : vector<1x128x256xbf16> to vector<128x256xbf16>
    %cst_32 = arith.constant dense<0.000000e+00> : vector<1x256xf32>
    %40 = tpu.matmul %5, %39, %cst_32 {dimension_numbers = #tpu.dot_dimension_numbers<[1], [0], [0], [1], [0, 0, 1, 1], [], []>} : vector<1x128xbf16>, vector<128x256xbf16>, vector<1x256xf32> -> vector<1x256xf32>
    %c2_33 = arith.constant 2 : index
    %c0_34 = arith.constant 0 : index
    %c0_35 = arith.constant 0 : index
    %41 = vector.load %arg4[%c2_33, %c0_34, %c0_35] : memref<4x32x256xbf16, #tpu.memory_space<vmem>>, vector<1x32x256xbf16>
    %42 = vector.shape_cast %41 : vector<1x32x256xbf16> to vector<32x256xbf16>
    %cst_36 = arith.constant dense<0.000000e+00> : vector<1x256xf32>
    %43 = tpu.matmul %7, %42, %cst_36 {dimension_numbers = #tpu.dot_dimension_numbers<[1], [0], [0], [1], [0, 0, 1, 1], [], []>} : vector<1x32xbf16>, vector<32x256xbf16>, vector<1x256xf32> -> vector<1x256xf32>
    %44 = arith.addf %40, %43 : vector<1x256xf32>
    %45 = vector.extract_strided_slice %44 {offsets = [0, 0], sizes = [1, 128], strides = [1, 1]} : vector<1x256xf32> to vector<1x128xf32>
    %c0_37 = arith.constant 0 : index
    %c4 = arith.constant 4 : index
    %c0_38 = arith.constant 0 : index
    %c0_39 = arith.constant 0 : index
    %46 = vector.load %arg5[%c0_37, %c4, %c0_38, %c0_39] : memref<1x8x1x128xf32, #tpu.memory_space<vmem>>, vector<1x1x1x128xf32>
    %47 = vector.shape_cast %46 : vector<1x1x1x128xf32> to vector<1x128xf32>
    %48 = vector.shape_cast %45 : vector<1x128xf32> to vector<1x1x1x128xf32>
    tpu.vector_store %arg5[%c0_37, %c4, %c0_38, %c0_39], %48 {strides = array<i32>} : memref<1x8x1x128xf32, #tpu.memory_space<vmem>>, vector<1x1x1x128xf32>,
    %49 = vector.extract_strided_slice %44 {offsets = [0, 128], sizes = [1, 128], strides = [1, 1]} : vector<1x256xf32> to vector<1x128xf32>
    %c0_40 = arith.constant 0 : index
    %c5 = arith.constant 5 : index
    %c0_41 = arith.constant 0 : index
    %c0_42 = arith.constant 0 : index
    %50 = vector.load %arg5[%c0_40, %c5, %c0_41, %c0_42] : memref<1x8x1x128xf32, #tpu.memory_space<vmem>>, vector<1x1x1x128xf32>
    %51 = vector.shape_cast %50 : vector<1x1x1x128xf32> to vector<1x128xf32>
    %52 = vector.shape_cast %49 : vector<1x128xf32> to vector<1x1x1x128xf32>
    tpu.vector_store %arg5[%c0_40, %c5, %c0_41, %c0_42], %52 {strides = array<i32>} : memref<1x8x1x128xf32, #tpu.memory_space<vmem>>, vector<1x1x1x128xf32>,
    %c3_43 = arith.constant 3 : index
    %c0_44 = arith.constant 0 : index
    %c0_45 = arith.constant 0 : index
    %53 = vector.load %arg3[%c3_43, %c0_44, %c0_45] : memref<4x128x256xbf16, #tpu.memory_space<vmem>>, vector<1x128x256xbf16>
    %54 = vector.shape_cast %53 : vector<1x128x256xbf16> to vector<128x256xbf16>
    %cst_46 = arith.constant dense<0.000000e+00> : vector<1x256xf32>
    %55 = tpu.matmul %5, %54, %cst_46 {dimension_numbers = #tpu.dot_dimension_numbers<[1], [0], [0], [1], [0, 0, 1, 1], [], []>} : vector<1x128xbf16>, vector<128x256xbf16>, vector<1x256xf32> -> vector<1x256xf32>
    %c3_47 = arith.constant 3 : index
    %c0_48 = arith.constant 0 : index
    %c0_49 = arith.constant 0 : index
    %56 = vector.load %arg4[%c3_47, %c0_48, %c0_49] : memref<4x32x256xbf16, #tpu.memory_space<vmem>>, vector<1x32x256xbf16>
    %57 = vector.shape_cast %56 : vector<1x32x256xbf16> to vector<32x256xbf16>
    %cst_50 = arith.constant dense<0.000000e+00> : vector<1x256xf32>
    %58 = tpu.matmul %7, %57, %cst_50 {dimension_numbers = #tpu.dot_dimension_numbers<[1], [0], [0], [1], [0, 0, 1, 1], [], []>} : vector<1x32xbf16>, vector<32x256xbf16>, vector<1x256xf32> -> vector<1x256xf32>
    %59 = arith.addf %55, %58 : vector<1x256xf32>
    %60 = vector.extract_strided_slice %59 {offsets = [0, 0], sizes = [1, 128], strides = [1, 1]} : vector<1x256xf32> to vector<1x128xf32>
    %c0_51 = arith.constant 0 : index
    %c6 = arith.constant 6 : index
    %c0_52 = arith.constant 0 : index
    %c0_53 = arith.constant 0 : index
    %61 = vector.load %arg5[%c0_51, %c6, %c0_52, %c0_53] : memref<1x8x1x128xf32, #tpu.memory_space<vmem>>, vector<1x1x1x128xf32>
    %62 = vector.shape_cast %61 : vector<1x1x1x128xf32> to vector<1x128xf32>
    %63 = vector.shape_cast %60 : vector<1x128xf32> to vector<1x1x1x128xf32>
    tpu.vector_store %arg5[%c0_51, %c6, %c0_52, %c0_53], %63 {strides = array<i32>} : memref<1x8x1x128xf32, #tpu.memory_space<vmem>>, vector<1x1x1x128xf32>,
    %64 = vector.extract_strided_slice %59 {offsets = [0, 128], sizes = [1, 128], strides = [1, 1]} : vector<1x256xf32> to vector<1x128xf32>
    %c0_54 = arith.constant 0 : index
    %c7 = arith.constant 7 : index
    %c0_55 = arith.constant 0 : index
    %c0_56 = arith.constant 0 : index
    %65 = vector.load %arg5[%c0_54, %c7, %c0_55, %c0_56] : memref<1x8x1x128xf32, #tpu.memory_space<vmem>>, vector<1x1x1x128xf32>
    %66 = vector.shape_cast %65 : vector<1x1x1x128xf32> to vector<1x128xf32>
    %67 = vector.shape_cast %64 : vector<1x128xf32> to vector<1x1x1x128xf32>
    tpu.vector_store %arg5[%c0_54, %c7, %c0_55, %c0_56], %67 {strides = array<i32>} : memref<1x8x1x128xf32, #tpu.memory_space<vmem>>, vector<1x1x1x128xf32>,
    return
  }
  func.func @transform_0(%arg0: i32, %arg1: i32) -> (i32, i32, i32) {
    %c0_i32 = arith.constant 0 : i32
    %c0_i32_0 = arith.constant 0 : i32
    %c0_i32_1 = arith.constant 0 : i32
    return %arg0, %c0_i32, %c0_i32_0 : i32, i32, i32
  }
  func.func @transform_1(%arg0: i32, %arg1: i32) -> (i32, i32, i32) {
    %c0_i32 = arith.constant 0 : i32
    %c0_i32_0 = arith.constant 0 : i32
    %c0_i32_1 = arith.constant 0 : i32
    %c0_i32_2 = arith.constant 0 : i32
    return %c0_i32, %c0_i32_0, %c0_i32_1 : i32, i32, i32
  }
  func.func @transform_2(%arg0: i32, %arg1: i32) -> (i32, i32, i32) {
    %c0_i32 = arith.constant 0 : i32
    %c0_i32_0 = arith.constant 0 : i32
    %c0_i32_1 = arith.constant 0 : i32
    %c0_i32_2 = arith.constant 0 : i32
    return %c0_i32, %c0_i32_0, %c0_i32_1 : i32, i32, i32
  }
  func.func @transform_3(%arg0: i32, %arg1: i32) -> (i32, i32, i32, i32) {
    %c0_i32 = arith.constant 0 : i32
    %c0_i32_0 = arith.constant 0 : i32
    %c0_i32_1 = arith.constant 0 : i32
    return %arg0, %c0_i32, %arg1, %c0_i32_0 : i32, i32, i32, i32
  }
}

</mosaic_0001>

<bundles_post_ra>
// kernel: tpu_custom_call.1
= control target key start
LH: loop header
LB: loop body
LE: loop exit
PB: predicated region body
PF: predicated region fallthrough
CT: control target
= control target key end

     0   :  { %8 = vsyncpa [#allocation3], 0  ;;  %s2002_s0 = inlined_call_operand.hbm [shape: f32[2,2,128], index: 0, kind: input, shape index: {}]   ;;  %s2003_s1 = inlined_call_operand.hbm [shape: bf16[4,128,256], index: 1, kind: input, shape index: {}]   ;;  %s2004_s2 = inlined_call_operand.hbm [shape: bf16[4,32,256], index: 2, kind: input, shape index: {}]   ;;  %s2005_s3 = inlined_call_operand.hbm [shape: f32[2,8,1,128], index: 3, kind: output, shape index: {}]  }
   0x1   :  { %10 = vsyncpa [#allocation3 + $0x1], 0 }
   0x2   :  { %11 = vsyncpa [#allocation6], 0 }
   0x3   :  { %12 = vsyncpa [#allocation4], 0 }
   0x4   :  { %14 = vsyncpa [#allocation4 + $0x1], 0  ;;  %s1724_s12 = smov 0   ;;  %s1726_s13 = smov 0  }
   0x5   :  { %s1728_s14 = smov 0   ;;  %s1730_s15 = smov 0  }
   0x6   :  { %s1732_s16 = smov 0   ;;  %s1734_s17 = smov 0  }
   0x7 LB: > { %s1187_s18 = sadd.s32 4294967295, %s1693_s17   ;;  %s1188_s19 = sadd.s32 4294967294, %s1693_s17   ;;  %s1693_s17 = sphi %s1734_s17, %s20_s17   ;;  %s1689_s16 = sphi %s1732_s16, %s2027_s16   ;;  %s1685_s15 = sphi %s1730_s15, %s2026_s15   ;;  %s1681_s14 = sphi %s1728_s14, %s2025_s14   ;;  %s1677_s13 = sphi %s1726_s13, %s2024_s13   ;;  %s1673_s12 = sphi %s1724_s12, %s2023_s12  }
   0x8   : > { %p52_p0 = scmp.ne.s32.totalorder %s1677_s13, %s1673_s12  ;;  %p1758_p1 = scmp.eq.s32.totalorder %s1187_s18, 0 }
   0x9   : > { %p1762_p2 = scmp.eq.s32.totalorder %s1187_s18, 1  ;;  %p126_p3 = scmp.eq.s32.totalorder %s1188_s19, 1 }
   0xa   : > { %s2010_s20 = scalar_select %p1758_p1, 1, 0 }
   0xb   : > { %p1768_p4 = por %p1758_p1, %p52_p0  ;;  %p1189_p5 = scmp.ge.s32.totalorder %s1693_s17, 1 }
   0xc   : > { %p1773_p6 = por %p126_p3, %p52_p0  ;;  %p133_p7 = scmp.lt.s32.totalorder %s1693_s17, 3 }
   0xd   : > { %s2012_s22 = scalar_select %p1768_p4, 1, 0 }
   0xe   : > { %s2013_s23 = scalar_select %p1773_p6, 1, 0 }
   0xf   : > { %p1778_p8 = pnand %p1189_p5, %p133_p7  ;;  %s1695_s25 = smov [#allocation5]  }
  0x10   : > { %s145_s26 = sshll.u32 %s1695_s25, 4  ;;  %s1696_s28 = smov [#allocation7]   ;;  %s1782_s26 = int_to_ptr.vmem [resolvable:$true] %s145_s26 }
  0x11   : > { %p1325_p9 = pneg %p1778_p8  ;;  %s158_s29 = sshll.u32 %s1696_s28, 4  ;;  %s1793_s29 = int_to_ptr.vmem [resolvable:$true] %s158_s29 }
  0x12   : > { %s1521_s5 = scalar_lea.hbm %s2003_s1, 8192 }
  0x13   : > { %p1789_p11 = pnand %p1325_p9, %p1758_p1  ;;  %p1522_p12 = scmp.ne.s32.totalorder %s2003_s1, %s1521_s5 }
  0x14   : > { %p1528_p5 = scmp.lt.u32.totalorder %s1521_s5, %s2003_s1 }
  0x15   : > { %p1523_p13 = pneg %p1789_p11 }
  0x17   : > { %p1524_p0 = pnand %p1523_p13, %p1522_p12 }
  0x19   : > { %p1525_p3 = pneg %p1524_p0 }
  0x1b   : > { %p1530_p7 = pnand %p1528_p5, %p1525_p3 }
  0x1d   : > { %1533 = shalt.err (!%p1530_p7)
}
  0x1e   : > { %s1534_s10 = scalar_lea.vmem %s1782_s26, 8192  ;;  %p1542_p1 = scmp.lt.s32.totalorder %s1782_s26, %s1782_s26 }
  0x1f   : > { %p1535_p9 = scmp.ne.s32.totalorder %s1782_s26, %s1534_s10  ;;  %p1543_p12 = scmp.lt.s32.totalorder %s1534_s10, %s1534_s10 }
  0x21   : > { %p1537_p10 = pnand %p1535_p9, %p1523_p13  ;;  %p1544_p0 = por %p1543_p12, %p1542_p1 }
  0x23   : > { %p1538_p6 = pneg %p1537_p10 }
  0x25   : > { %p1545_p4 = pnand %p1544_p0, %p1538_p6 }
  0x27   : > { %1548 = shalt.err (!%p1545_p4)
}
  0x28   : > { %s1697_s11 = smov 128   ;;  %s1698_s18 = smov 8  }
  0x29   : > { %1328 = dma.hbm_to_vmem [thread:$0]  (!%p1789_p11), %s2003_s1, 8192, %s1782_s26, [#allocation6], %s1697_s11, %s1697_s11, %s1698_s18  }
  0x2a   : > { %s1549_s4 = scalar_lea.hbm %s2004_s2, 2048 }
  0x2b   : > { %p1550_p1 = scmp.ne.s32.totalorder %s2004_s2, %s1549_s4  ;;  %p1556_p10 = scmp.lt.u32.totalorder %s1549_s4, %s2004_s2 }
  0x2d   : > { %p1552_p4 = pnand %p1550_p1, %p1523_p13 }
  0x2f   : > { %p1553_p6 = pneg %p1552_p4 }
  0x31   : > { %p1558_p3 = pnand %p1556_p10, %p1553_p6 }
  0x33   : > { %1561 = shalt.err (!%p1558_p3)
}
  0x34   : > { %s1562_s26 = scalar_lea.vmem %s1793_s29, 2048  ;;  %p1570_p12 = scmp.lt.s32.totalorder %s1793_s29, %s1793_s29 }
  0x35   : > { %p1563_p5 = scmp.ne.s32.totalorder %s1793_s29, %s1562_s26  ;;  %p1571_p0 = scmp.lt.s32.totalorder %s1562_s26, %s1562_s26 }
  0x37   : > { %p1565_p7 = pnand %p1563_p5, %p1523_p13  ;;  %p1572_p1 = por %p1571_p0, %p1570_p12 }
  0x39   : > { %p1566_p9 = pneg %p1565_p7 }
  0x3b   : > { %p1573_p4 = pnand %p1572_p1, %p1566_p9 }
  0x3d   : > { %1576 = shalt.err (!%p1573_p4)
}
  0x3e   : > { %1331 = dma.hbm_to_vmem [thread:$0]  (!%p1789_p11), %s2004_s2, 2048, %s1793_s29, [#allocation6], %s1697_s11, %s1697_s11, %s1698_s18  }
  0x3f   : > { %s32_s19 = sadd.s32 1, %s1689_s16  ;;  %s39_s25 = sadd.s32 1, %s1681_s14 }
  0x40   : > { %p34_p13 = scmp.ge.s32.totalorder %s32_s19, 2  ;;  %p46_p6 = scmp.ne.s32.totalorder %s1681_s14, %s1677_s13 }
  0x41   : > { %p47_p10 = scmp.eq.s32.totalorder %s1693_s17, 0  ;;  %p1342_p3 = scmp.lt.s32.totalorder %s1693_s17, 2 }
  0x42   : > { %s2029_s19 = smov (%p34_p13, %s32_s19), 0  ;;  %p1857_p7 = por %p1762_p2, %p46_p6 }
  0x43   : > { %p48_p5 = por %p47_p10, %p46_p6  ;;  %s36_s28 = ssub.s32 %s1689_s16, %s2029_s19 }
  0x44   : > { %s2016_s27 = scalar_select %p1857_p7, 1, 0 }
  0x45   : > { %s172_s30 = sand.u32 1, %s1681_s14   ;;  %p37_p9 = scmp.eq.s32.totalorder %s36_s28, 0 }
  0x46   : > { %s1193_s29 = sshll.u32 %s172_s30, 1  ;;  %s1194_s11 = sshll.u32 %s1689_s16, 5 }
  0x47   : > { %s1866_s18 = scalar_select %p37_p9, %s1681_s14, %s39_s25  }
  0x48   : > { %s1871_s6 = scalar_lea.hbm %s2002_s0, %s1194_s11  ;;  %s176_s21 = scalar_lea.vmem [#allocation2], %s1193_s29 }
  0x49   : > { %s183_s7 = sshll.u32 %s176_s21, 4  ;;  %p1875_p2 = pnand %p1342_p3, %p48_p5  ;;  %s1879_s7 = int_to_ptr.vmem [resolvable:$true] %s183_s7 }
  0x4a   : > { %s173_s26 = scalar_lea.sflag [#allocation3], %s172_s30  ;;  %s1577_s9 = scalar_lea.hbm %s1871_s6, 32 }
  0x4b   : > { %p1578_p11 = scmp.ne.s32.totalorder %s1871_s6, %s1577_s9  ;;  %p1579_p12 = pneg %p1875_p2 }
  0x4c   : > { %s1582_s28 = scalar_lea.hbm %s2002_s0, 64  ;;  %p1583_p4 = scmp.lt.u32.totalorder %s1871_s6, %s2002_s0 }
  0x4d   : > { %p1580_p0 = pnand %p1579_p12, %p1578_p11  ;;  %p1584_p13 = scmp.lt.u32.totalorder %s1582_s28, %s1577_s9 }
  0x4e   : > { %p1586_p10 = scmp.lt.u32.totalorder %s1577_s9, %s1871_s6 }
  0x4f   : > { %p1581_p1 = pneg %p1580_p0  ;;  %p1585_p6 = por %p1584_p13, %p1583_p4 }
  0x51   : > { %p1587_p3 = por %p1586_p10, %p1585_p6 }
  0x53   : > { %p1588_p5 = pnand %p1587_p3, %p1581_p1 }
  0x55   : > { %1591 = shalt.err (!%p1588_p5)
}
  0x56   : > { %s1592_s30 = scalar_lea.vmem %s1879_s7, 32  ;;  %s1699_s4 = smov [#allocation2]  }
  0x57   : > { %p1593_p9 = scmp.ne.s32.totalorder %s1879_s7, %s1592_s30  ;;  %s1597_s5 = sshll.u32 %s1699_s4, 4  ;;  %s1598_s5 = int_to_ptr.vmem [resolvable:$false] %s1597_s5 }
  0x58   : > { %s1599_s21 = scalar_lea.vmem %s1598_s5, 64  ;;  %p1600_p7 = scmp.lt.s32.totalorder %s1879_s7, %s1598_s5 }
  0x59   : > { %p1595_p11 = pnand %p1593_p9, %p1579_p12  ;;  %p1601_p4 = scmp.lt.s32.totalorder %s1599_s21, %s1592_s30 }
  0x5b   : > { %p1596_p0 = pneg %p1595_p11  ;;  %p1602_p13 = por %p1601_p4, %p1600_p7 }
  0x5d   : > { %p1603_p6 = pnand %p1602_p13, %p1596_p0 }
  0x5f   : > { %1606 = shalt.err (!%p1603_p6)
}
  0x60   : > { %1335 = dma.hbm_to_vmem [thread:$0]  (!%p1875_p2), %s1871_s6, 32, %s1879_s7, %s173_s26  }
  0x61   : > { %192 = sbr.rel (%p1778_p8) target bundleno = 419 (0x1a3), region = 32  ;;  %s1909_s9 = sand.u32 (!%p1778_p8), 1, %s1677_s13  }
  0x62   : > { %s1196_s10 = sshll.u32 (!%p1778_p8), %s1909_s9, 1  ;;  %s195_s25 = scalar_lea.sflag (!%p1778_p8), [#allocation3], %s1909_s9 }
  0x63   : > { %s198_s28 = scalar_lea.vmem (!%p1778_p8), [#allocation2], %s1196_s10  ;;  %p2018_p7 = scmp.ne.s32.totalorder (!%p1778_p8), %s2012_s22, 0 }
  0x68   : > { %1660 = dma.done.wait (%p2018_p7), %s195_s25, 32  }
  0x69   : > { %1662 = vsyncadd (%p2018_p7), %s195_s25, 4294967264  ;;  %p2019_p12 = scmp.ne.s32.totalorder %s2010_s20, 0 }
  0x6b   : > { %1664 = dma.done.wait (%p2019_p12), [#allocation6], 10240  }
  0x6c   : > { %1666 = vsyncadd (%p2019_p12), [#allocation6], 4294957056  ;;  %v1700_v0 = vmov 0   ;;  %v1401_v1 = vld [vmem:[#allocation7 + $0x4] ss:$8 sps:$4 sm:$0xff]   ;;  %vm276_vm0 = vcmask 261120  }
  0x6d   : > { %312 = vmatprep.mubr.bf16.mxu0 %v1700_v0  ;;  %519 = vmatprep.mubr.bf16.mxu1 %v1700_v0  ;;  %v1403_v2 = vld [vmem:[#allocation7 + $0x24] ss:$8 sps:$4 sm:$0xff]   ;;  %v1405_v3 = vld [vmem:[#allocation7] ss:$8 sps:$4 sm:$0xff]   ;;  %v1407_v5 = vld [vmem:[#allocation7 + $0x14] ss:$8 sps:$4 sm:$0xff]  }
  0x6e   : > { %280 = vmatprep.subr.bf16.mxu0 %v1401_v1  ;;  %v1406_v4 = vld [vmem:[#allocation7 + $0x20] ss:$8 sps:$4 sm:$0xff]   ;;  %487 = vmatprep.subr.bf16.mxu1 %v1403_v2  ;;  %v1409_v6 = vld [vmem:[#allocation7 + $0x34] ss:$8 sps:$4 sm:$0xff]   ;;  %v1411_v7 = vld [vmem:[#allocation7 + $0x10] ss:$8 sps:$4 sm:$0xff]  }
  0x6f   : > { %281 = vmatpush1.bf16.msra.mxu0 %v1405_v3  ;;  %488 = vmatpush1.bf16.msra.mxu1 %v1406_v4  ;;  %v1412_v8 = vld [vmem:[#allocation7 + $0x30] ss:$8 sps:$4 sm:$0xff]   ;;  %v1415_v9 = vld [vmem:[#allocation5 + $0x4] ss:$8 sps:$4 sm:$0xff]   ;;  %v231_v11 = vld [vmem:[%s198_s28] sm:$0x3] }
  0x70   : > { %282 = vmatprep.subr.bf16.mxu0 %v1407_v5  ;;  %489 = vmatprep.subr.bf16.mxu1 %v1409_v6  ;;  %v1418_v10 = vld [vmem:[#allocation5 + $0x84] ss:$8 sps:$4 sm:$0xff]   ;;  %v1413_v12 = vld [vmem:[#allocation5] ss:$8 sps:$4 sm:$0xff]   ;;  %v1923_v13 = vpack.c.bf16 %v231_v11, %v231_v11  ;;  %v1421_v15 = vld [vmem:[#allocation5 + $0x14] ss:$8 sps:$4 sm:$0xff]  }
  0x71   : > { %v1416_v14 = vld [vmem:[#allocation5 + $0x80] ss:$8 sps:$4 sm:$0xff]   ;;  %v1424_v17 = vld [vmem:[#allocation5 + $0x94] ss:$8 sps:$4 sm:$0xff]   ;;  %v1419_v18 = vld [vmem:[#allocation5 + $0x10] ss:$8 sps:$4 sm:$0xff]  }
  0x72   : > { %v1926_v16 = vshrl.u32 %v1923_v13, 16  ;;  %v1422_v19 = vld [vmem:[#allocation5 + $0x90] ss:$8 sps:$4 sm:$0xff]   ;;  %v1427_v20 = vld [vmem:[#allocation5 + $0x24] ss:$8 sps:$4 sm:$0xff]   ;;  %s1199_s20 = sshll.u32 %s1909_s9, 3 }
  0x73   : > { %283 = vmatpush1.bf16.msra.mxu0 %v1411_v7  ;;  %490 = vmatpush1.bf16.msra.mxu1 %v1412_v8  ;;  %v1430_v21 = vld [vmem:[#allocation5 + $0xa4] ss:$8 sps:$4 sm:$0xff]   ;;  %v1425_v22 = vld [vmem:[#allocation5 + $0x20] ss:$8 sps:$4 sm:$0xff]   ;;  %v1433_v24 = vld [vmem:[#allocation5 + $0x34] ss:$8 sps:$4 sm:$0xff]  }
  0x74   : > { %401 = vmatprep.subr.bf16.mxu0 %v1415_v9  ;;  %608 = vmatprep.subr.bf16.mxu1 %v1418_v10  ;;  %v1428_v23 = vld [vmem:[#allocation5 + $0xa0] ss:$8 sps:$4 sm:$0xff]   ;;  %v1436_v25 = vld [vmem:[#allocation5 + $0xb4] ss:$8 sps:$4 sm:$0xff]   ;;  %v1431_v26 = vld [vmem:[#allocation5 + $0x30] ss:$8 sps:$4 sm:$0xff]  }
  0x75   : > { %v1434_v27 = vld [vmem:[#allocation5 + $0xb0] ss:$8 sps:$4 sm:$0xff]   ;;  %v1439_v28 = vld [vmem:[#allocation5 + $0x44] ss:$8 sps:$4 sm:$0xff]   ;;  %v1437_v30 = vld [vmem:[#allocation5 + $0x40] ss:$8 sps:$4 sm:$0xff]  }
  0x76   : > { %1204 = vmatmul.mubr.msk.bf16.vlgmr.msra.gmra.mrb[0].mxu0 %vm276_vm0, %v1926_v16  ;;  %1226 = vmatmul.mubr.msk.bf16.vlgmr.msra.gmra.mrb[0].mxu1 %vm276_vm0, %v1926_v16  ;;  %v1442_v29 = vld [vmem:[#allocation5 + $0xc4] ss:$8 sps:$4 sm:$0xff]   ;;  %v1440_v31 = vld [vmem:[#allocation5 + $0xc0] ss:$8 sps:$4 sm:$0xff]   ;;  %v1445_v32 = vld [vmem:[#allocation5 + $0x54] ss:$8 sps:$4 sm:$0xff]  }
  0x77   : > { %402 = vmatpush1.bf16.msra.mxu0 %v1413_v12  ;;  %609 = vmatpush1.bf16.msra.mxu1 %v1416_v14  ;;  %v1448_v33 = vld [vmem:[#allocation5 + $0xd4] ss:$8 sps:$4 sm:$0xff]   ;;  %v1443_v34 = vld [vmem:[#allocation5 + $0x50] ss:$8 sps:$4 sm:$0xff]   ;;  %v1451_v36 = vld [vmem:[#allocation5 + $0x64] ss:$8 sps:$4 sm:$0xff]  }
  0x78   : > { %403 = vmatprep.subr.bf16.mxu0 %v1421_v15  ;;  %610 = vmatprep.subr.bf16.mxu1 %v1424_v17  ;;  %v1446_v35 = vld [vmem:[#allocation5 + $0xd0] ss:$8 sps:$4 sm:$0xff]   ;;  %v1454_v37 = vld [vmem:[#allocation5 + $0xe4] ss:$8 sps:$4 sm:$0xff]   ;;  %v1449_v38 = vld [vmem:[#allocation5 + $0x60] ss:$8 sps:$4 sm:$0xff]  }
  0x79   : > { %433 = vmatprep.mubr.bf16.mxu0 %v1700_v0  ;;  %640 = vmatprep.mubr.bf16.mxu1 %v1700_v0  ;;  %v1452_v39 = vld [vmem:[#allocation5 + $0xe0] ss:$8 sps:$4 sm:$0xff]   ;;  %v1457_v40 = vld [vmem:[#allocation5 + $0x74] ss:$8 sps:$4 sm:$0xff]   ;;  %v1455_v42 = vld [vmem:[#allocation5 + $0x70] ss:$8 sps:$4 sm:$0xff]  }
  0x7a   : > { %v1460_v41 = vld [vmem:[#allocation5 + $0xf4] ss:$8 sps:$4 sm:$0xff]   ;;  %v1458_v43 = vld [vmem:[#allocation5 + $0xf0] ss:$8 sps:$4 sm:$0xff]   ;;  %v1463_v44 = vld [vmem:[#allocation7 + $0x44] ss:$8 sps:$4 sm:$0xff]  }
  0x7b   : > { %404 = vmatpush1.bf16.msra.mxu0 %v1419_v18  ;;  %611 = vmatpush1.bf16.msra.mxu1 %v1422_v19  ;;  %v1466_v45 = vld [vmem:[#allocation7 + $0x64] ss:$8 sps:$4 sm:$0xff]   ;;  %v1461_v46 = vld [vmem:[#allocation7 + $0x40] ss:$8 sps:$4 sm:$0xff]   ;;  %v1469_v48 = vld [vmem:[#allocation7 + $0x54] ss:$8 sps:$4 sm:$0xff]  }
  0x7c   : > { %405 = vmatprep.subr.bf16.mxu0 %v1427_v20  ;;  %612 = vmatprep.subr.bf16.mxu1 %v1430_v21  ;;  %v1464_v47 = vld [vmem:[#allocation7 + $0x60] ss:$8 sps:$4 sm:$0xff]   ;;  %v1472_v49 = vld [vmem:[#allocation7 + $0x74] ss:$8 sps:$4 sm:$0xff]   ;;  %v1467_v50 = vld [vmem:[#allocation7 + $0x50] ss:$8 sps:$4 sm:$0xff]  }
  0x7d   : > { %v1470_v51 = vld [vmem:[#allocation7 + $0x70] ss:$8 sps:$4 sm:$0xff]   ;;  %v1475_v52 = vld [vmem:[#allocation5 + $0x104] ss:$8 sps:$4 sm:$0xff]   ;;  %v1473_v54 = vld [vmem:[#allocation5 + $0x100] ss:$8 sps:$4 sm:$0xff]  }
  0x7e   : > { %v1478_v53 = vld [vmem:[#allocation5 + $0x184] ss:$8 sps:$4 sm:$0xff]   ;;  %v1476_v55 = vld [vmem:[#allocation5 + $0x180] ss:$8 sps:$4 sm:$0xff]   ;;  %v1481_v56 = vld [vmem:[#allocation5 + $0x114] ss:$8 sps:$4 sm:$0xff]  }
  0x7f   : > { %406 = vmatpush1.bf16.msra.mxu0 %v1425_v22  ;;  %613 = vmatpush1.bf16.msra.mxu1 %v1428_v23  ;;  %v1484_v57 = vld [vmem:[#allocation5 + $0x194] ss:$8 sps:$4 sm:$0xff]   ;;  %v1479_v58 = vld [vmem:[#allocation5 + $0x110] ss:$8 sps:$4 sm:$0xff]   ;;  %v1487_v60 = vld [vmem:[#allocation5 + $0x124] ss:$8 sps:$4 sm:$0xff]  }
  0x80   : > { %407 = vmatprep.subr.bf16.mxu0 %v1433_v24  ;;  %614 = vmatprep.subr.bf16.mxu1 %v1436_v25  ;;  %v1482_v59 = vld [vmem:[#allocation5 + $0x190] ss:$8 sps:$4 sm:$0xff]   ;;  %v1490_v61 = vld [vmem:[#allocation5 + $0x1a4] ss:$8 sps:$4 sm:$0xff]   ;;  %v1485_v62 = vld [vmem:[#allocation5 + $0x120] ss:$8 sps:$4 sm:$0xff]  }
  0x81   : > { %v1488_v63 = vld [vmem:[#allocation5 + $0x1a0] ss:$8 sps:$4 sm:$0xff]   ;;  %v1493_v1 = vld [vmem:[#allocation5 + $0x134] ss:$8 sps:$4 sm:$0xff]   ;;  %v1491_v3 = vld [vmem:[#allocation5 + $0x130] ss:$8 sps:$4 sm:$0xff]  }
  0x82   : > { %v1496_v2 = vld [vmem:[#allocation5 + $0x1b4] ss:$8 sps:$4 sm:$0xff]   ;;  %v1494_v4 = vld [vmem:[#allocation5 + $0x1b0] ss:$8 sps:$4 sm:$0xff]   ;;  %v1499_v5 = vld [vmem:[#allocation5 + $0x144] ss:$8 sps:$4 sm:$0xff]  }
  0x83   : > { %408 = vmatpush1.bf16.msra.mxu0 %v1431_v26  ;;  %615 = vmatpush1.bf16.msra.mxu1 %v1434_v27  ;;  %v1502_v6 = vld [vmem:[#allocation5 + $0x1c4] ss:$8 sps:$4 sm:$0xff]   ;;  %v1497_v7 = vld [vmem:[#allocation5 + $0x140] ss:$8 sps:$4 sm:$0xff]   ;;  %v1505_v8 = vld [vmem:[#allocation5 + $0x154] ss:$8 sps:$4 sm:$0xff]  }
  0x84   : > { %409 = vmatprep.subr.bf16.mxu0 %v1439_v28  ;;  %616 = vmatprep.subr.bf16.mxu1 %v1442_v29  ;;  %v1508_v9 = vld [vmem:[#allocation5 + $0x1d4] ss:$8 sps:$4 sm:$0xff]   ;;  %v1503_v10 = vld [vmem:[#allocation5 + $0x150] ss:$8 sps:$4 sm:$0xff]   ;;  %v1511_v12 = vld [vmem:[#allocation5 + $0x164] ss:$8 sps:$4 sm:$0xff]  }
  0x85   : > { %v1506_v11 = vld [vmem:[#allocation5 + $0x1d0] ss:$8 sps:$4 sm:$0xff]   ;;  %v1514_v14 = vld [vmem:[#allocation5 + $0x1e4] ss:$8 sps:$4 sm:$0xff]   ;;  %v1509_v15 = vld [vmem:[#allocation5 + $0x160] ss:$8 sps:$4 sm:$0xff]  }
  0x86   : > { %v1517_v17 = vld [vmem:[#allocation5 + $0x174] ss:$8 sps:$4 sm:$0xff]   ;;  %v1515_v19 = vld [vmem:[#allocation5 + $0x170] ss:$8 sps:$4 sm:$0xff]   ;;  %s228_s22 = scalar_lea.vmem [#allocation8], %s1199_s20  ;;  %s1296_s6 = sshll.u32 %s1685_s15, 7 }
  0x87   : > { %410 = vmatpush1.bf16.msra.mxu0 %v1437_v30  ;;  %617 = vmatpush1.bf16.msra.mxu1 %v1440_v31  ;;  %v1520_v18 = vld [vmem:[#allocation5 + $0x1f4] ss:$8 sps:$4 sm:$0xff]   ;;  %v1518_v20 = vld [vmem:[#allocation5 + $0x1f0] ss:$8 sps:$4 sm:$0xff]   ;;  %s1084_s24 = sshll.u32 %s228_s22, 4  ;;  %s1953_s26 = scalar_lea.hbm %s2005_s3, %s1296_s6  ;;  %s1948_s24 = int_to_ptr.vmem [resolvable:$true] %s1084_s24 }
  0x88   : > { %411 = vmatprep.subr.bf16.mxu0 %v1445_v32  ;;  %618 = vmatprep.subr.bf16.mxu1 %v1448_v33  ;;  %s1070_s15 = scalar_lea.sflag [#allocation4], %s1909_s9  ;;  %s1607_s29 = scalar_lea.vmem %s1948_s24, 128 }
  0x89   : > { %p1608_p8 = scmp.ne.s32.totalorder %s1948_s24, %s1607_s29  ;;  %p2020_p2 = scmp.ne.s32.totalorder %s2016_s27, 0 }
  0x8a   : > { %s1701_s11 = smov [#allocation8]  }
  0x8b   : > { %412 = vmatpush1.bf16.msra.mxu0 %v1443_v34  ;;  %619 = vmatpush1.bf16.msra.mxu1 %v1446_v35  ;;  %p1609_p1 = pnand %p1608_p8, %p2020_p2  ;;  %s1611_s30 = sshll.u32 %s1701_s11, 4  ;;  %s1612_s30 = int_to_ptr.vmem [resolvable:$false] %s1611_s30 }
  0x8c   : > { %413 = vmatprep.subr.bf16.mxu0 %v1451_v36  ;;  %620 = vmatprep.subr.bf16.mxu1 %v1454_v37  ;;  %s1613_s4 = scalar_lea.vmem %s1612_s30, 256  ;;  %p1614_p3 = scmp.lt.s32.totalorder %s1948_s24, %s1612_s30 }
  0x8d   : > { %p1610_p10 = pneg %p1609_p1  ;;  %p1615_p5 = scmp.lt.s32.totalorder %s1613_s4, %s1607_s29 }
  0x8f   : > { %414 = vmatpush1.bf16.msra.mxu0 %v1449_v38  ;;  %621 = vmatpush1.bf16.msra.mxu1 %v1452_v39  ;;  %p1616_p9 = por %p1615_p5, %p1614_p3 }
  0x90   : > { %415 = vmatprep.subr.bf16.mxu0 %v1457_v40  ;;  %622 = vmatprep.subr.bf16.mxu1 %v1460_v41 }
  0x91   : > { %p1617_p11 = pnand %p1616_p9, %p1610_p10 }
  0x93   : > { %416 = vmatpush1.bf16.msra.mxu0 %v1455_v42  ;;  %623 = vmatpush1.bf16.msra.mxu1 %v1458_v43 }
  0x94   : > { %695 = vmatprep.subr.bf16.mxu0 %v1463_v44  ;;  %903 = vmatprep.subr.bf16.mxu1 %v1466_v45 }
  0x96   : > { %434 = vmatmul.mubr.bf16.vlgmr.msra.gmra.mrb[0].mxu0 %v1923_v13  ;;  %641 = vmatmul.mubr.bf16.vlgmr.msra.gmra.mrb[0].mxu1 %v1923_v13 }
  0x97   : > { %696 = vmatpush1.bf16.msra.mxu0 %v1461_v46  ;;  %904 = vmatpush1.bf16.msra.mxu1 %v1464_v47 }
  0x98   : > { %697 = vmatprep.subr.bf16.mxu0 %v1469_v48  ;;  %905 = vmatprep.subr.bf16.mxu1 %v1472_v49 }
  0x99   : > { %727 = vmatprep.mubr.bf16.mxu0 %v1700_v0  ;;  %935 = vmatprep.mubr.bf16.mxu1 %v1700_v0 }
  0x9b   : > { %698 = vmatpush1.bf16.msra.mxu0 %v1467_v50  ;;  %906 = vmatpush1.bf16.msra.mxu1 %v1470_v51 }
  0x9c   : > { %816 = vmatprep.subr.bf16.mxu0 %v1475_v52  ;;  %1024 = vmatprep.subr.bf16.mxu1 %v1478_v53 }
  0x9e   : > { %1249 = vmatmul.mubr.msk.bf16.vlgmr.msra.gmra.mrb[4].mxu0 %vm276_vm0, %v1926_v16  ;;  %1272 = vmatmul.mubr.msk.bf16.vlgmr.msra.gmra.mrb[4].mxu1 %vm276_vm0, %v1926_v16  ;;  %v1512_v16 = vld [vmem:[#allocation5 + $0x1e0] ss:$8 sps:$4 sm:$0xff]  }
  0x9f   : > { %817 = vmatpush1.bf16.msra.mxu0 %v1473_v54  ;;  %1025 = vmatpush1.bf16.msra.mxu1 %v1476_v55 }
  0xa0   : > { %818 = vmatprep.subr.bf16.mxu0 %v1481_v56  ;;  %1026 = vmatprep.subr.bf16.mxu1 %v1484_v57 }
  0xa1   : > { %848 = vmatprep.mubr.bf16.mxu0 %v1700_v0  ;;  %1056 = vmatprep.mubr.bf16.mxu1 %v1700_v0  ;;  %v1500_v0 = vld [vmem:[#allocation5 + $0x1c0] ss:$8 sps:$4 sm:$0xff]  }
  0xa3   : > { %819 = vmatpush1.bf16.msra.mxu0 %v1479_v58  ;;  %1027 = vmatpush1.bf16.msra.mxu1 %v1482_v59 }
  0xa4   : > { %820 = vmatprep.subr.bf16.mxu0 %v1487_v60  ;;  %1028 = vmatprep.subr.bf16.mxu1 %v1490_v61 }
  0xa7   : > { %821 = vmatpush1.bf16.msra.mxu0 %v1485_v62  ;;  %1029 = vmatpush1.bf16.msra.mxu1 %v1488_v63 }
  0xa8   : > { %822 = vmatprep.subr.bf16.mxu0 %v1493_v1  ;;  %1030 = vmatprep.subr.bf16.mxu1 %v1496_v2 }
  0xab   : > { %823 = vmatpush1.bf16.msra.mxu0 %v1491_v3  ;;  %1031 = vmatpush1.bf16.msra.mxu1 %v1494_v4 }
  0xac   : > { %824 = vmatprep.subr.bf16.mxu0 %v1499_v5  ;;  %1032 = vmatprep.subr.bf16.mxu1 %v1502_v6 }
  0xaf   : > { %825 = vmatpush1.bf16.msra.mxu0 %v1497_v7  ;;  %1033 = vmatpush1.bf16.msra.mxu1 %v1500_v0 }
  0xb0   : > { %826 = vmatprep.subr.bf16.mxu0 %v1505_v8  ;;  %1034 = vmatprep.subr.bf16.mxu1 %v1508_v9 }
  0xb3   : > { %827 = vmatpush1.bf16.msra.mxu0 %v1503_v10  ;;  %1035 = vmatpush1.bf16.msra.mxu1 %v1506_v11 }
  0xb4   : > { %828 = vmatprep.subr.bf16.mxu0 %v1511_v12  ;;  %1036 = vmatprep.subr.bf16.mxu1 %v1514_v14 }
  0xb7   : > { %829 = vmatpush1.bf16.msra.mxu0 %v1509_v15  ;;  %1037 = vmatpush1.bf16.msra.mxu1 %v1512_v16 }
  0xb8   : > { %830 = vmatprep.subr.bf16.mxu0 %v1517_v17  ;;  %1038 = vmatprep.subr.bf16.mxu1 %v1520_v18 }
  0xbb   : > { %831 = vmatpush1.bf16.msra.mxu0 %v1515_v19  ;;  %1039 = vmatpush1.bf16.msra.mxu1 %v1518_v20 }
  0xbe   : > { %849 = vmatmul.mubr.bf16.vlgmr.msra.gmra.mrb[4].mxu0 %v1923_v13  ;;  %1057 = vmatmul.mubr.bf16.vlgmr.msra.gmra.mrb[4].mxu1 %v1923_v13 }
 0x169   : > { %v435_v21 = vpop.f32.mrb[0].mxu0  ;;  %v642_v22 = vpop.f32.mrb[0].mxu1 }
 0x16a   : > { %442 = vst [vmem:[%s228_s22] sm:$0x1] %v435_v21  ;;  %1243 = vst [vmem:[%s228_s22 + $0x2] sm:$0x1] %v642_v22  ;;  %v437_v23 = vpop.f32.mrb[1].mxu0  ;;  %v644_v24 = vpop.f32.mrb[1].mxu1 }
 0x16b   : > { %1221 = vst [vmem:[%s228_s22 + $0x1] sm:$0x1] %v437_v23  ;;  %1244 = vst [vmem:[%s228_s22 + $0x3] sm:$0x1] %v644_v24  ;;  %v439_v25 = vpop.f32.mrb[2].mxu0  ;;  %v646_v26 = vpop.f32.mrb[2].mxu1 }
 0x16c   : > { %v440_v27 = vpop.f32.mrb[3].mxu0  ;;  %v647_v28 = vpop.f32.mrb[3].mxu1 }
 0x191   : > { %v850_v13 = vpop.f32.mrb[4].mxu0  ;;  %v1058_v29 = vpop.f32.mrb[4].mxu1 }
 0x192   : > { %1266 = vst [vmem:[%s228_s22 + $0x4] sm:$0x1] %v850_v13  ;;  %1289 = vst [vmem:[%s228_s22 + $0x6] sm:$0x1] %v1058_v29  ;;  %v852_v30 = vpop.f32.mrb[5].mxu0  ;;  %v1060_v31 = vpop.f32.mrb[5].mxu1 }
 0x193   : > { %1267 = vst [vmem:[%s228_s22 + $0x5] sm:$0x1] %v852_v30  ;;  %1290 = vst [vmem:[%s228_s22 + $0x7] sm:$0x1] %v1060_v31  ;;  %v854_v32 = vpop.f32.mrb[6].mxu0  ;;  %v1062_v33 = vpop.f32.mrb[6].mxu1 }
 0x194   : > { %v855_v34 = vpop.f32.mrb[7].mxu0  ;;  %v1063_v35 = vpop.f32.mrb[7].mxu1 }
 0x195   : > { %1620 = shalt.err (!%p1617_p11)
}
 0x196   : > { %s1621_s5 = scalar_lea.hbm %s1953_s26, 128  ;;  %s1625_s25 = scalar_lea.hbm %s2005_s3, 256 }
 0x197   : > { %p1622_p0 = scmp.ne.s32.totalorder %s1953_s26, %s1621_s5  ;;  %p1626_p6 = scmp.lt.u32.totalorder %s1953_s26, %s2005_s3 }
 0x198   : > { %p1627_p7 = scmp.lt.u32.totalorder %s1625_s25, %s1621_s5  ;;  %p1629_p8 = scmp.lt.u32.totalorder %s1621_s5, %s1953_s26 }
 0x199   : > { %p1623_p4 = pnand %p1622_p0, %p2020_p2 }
 0x19a   : > { %p1628_p12 = por %p1627_p7, %p1626_p6 }
 0x19b   : > { %p1624_p13 = pneg %p1623_p4 }
 0x19c   : > { %p1630_p1 = por %p1629_p8, %p1628_p12 }
 0x19e   : > { %p1631_p10 = pnand %p1630_p1, %p1624_p13 }
 0x1a0   : > { %1634 = shalt.err (!%p1631_p10)
}
 0x1a1   : > { %s1702_s22 = smov 16   ;;  %s1703_s6 = smov 1  }
 0x1a2   : > { %1323 = dma.vmem_to_hbm [thread:$0]  (%p2020_p2), %s1948_s24, 128, %s1953_s26, %s1070_s15, %s1702_s22, %s1702_s22, %s1703_s6  }
 0x1a3 PF: > { %s1099_s7 = sand.u32 1, %s1673_s12   ;;  %p2021_p3 = scmp.ne.s32.totalorder %s2013_s23, 0 }
 0x1a4   : > { %p2022_p5 = scmp.ge.s32.totalorder %s1693_s17, 2  ;;  %s1100_s8 = scalar_lea.sflag [#allocation4], %s1099_s7 }
 0x1a6   : > { %p1337_p9 = pnand %p2022_p5, %p2021_p3 }
 0x1a8   : > { %1668 = dma.done.wait (!%p1337_p9), %s1100_s8, 128  }
 0x1a9   : > { %1670 = vsyncadd (!%p1337_p9), %s1100_s8, 4294967168  ;;  %s20_s17 = sadd.s32 1, %s1693_s17   ;;  %s2023_s12 = smov %s1677_s13 }
 0x1aa   : > { %p17_p11 = scmp.ge.s32.totalorder %s20_s17, 4   ;;  %s2024_s13 = smov %s1681_s14 }
 0x1ab   : > { %s2025_s14 = smov %s1866_s18  ;;  %s2026_s15 = smov %s1689_s16 }
 0x1ac   : > { %s2027_s16 = smov %s2029_s19  ;;  %19 = sbr.rel (!%p17_p11) target bundleno = 7 (0x7), region = 99 }
 0x1b3   :  { %1105 = vsyncpa [#allocation3], 1 }
 0x1b4   :  { %1107 = vsyncpa [#allocation3 + $0x1], 1 }
 0x1b5   :  { %1108 = vsyncpa [#allocation6], 1 }
 0x1b6   :  { %1109 = vsyncpa [#allocation4], 1 }
 0x1b7   :  { %1111 = vsyncpa [#allocation4 + $0x1], 1 }

</bundles_post_ra>
